<compile_context>
chip_gen: v7x
topology: tpu7x:2x2x1
jax: 0.10.0
libtpu: 0.0.40
codegen_flags: <defaults>
</compile_context>

<pallas_src>
import functools

import jax
import jax.numpy as jnp
from jax import lax
from jax.experimental import pallas as pl
from jax.experimental.pallas import tpu as pltpu

EPSILON = 1e-06


def _focal_kernel(p_ref, t_ref, out_ref, *, alpha, gamma, tile_m, hw,
                  need_mask, need_softmax):
    # p_ref:   [L, tile_m, 128]  logits (class axis leading -> elementwise class math)
    # t_ref:   [tile_m, 128]     raw integer target (0 = negative, !=0 = positive)
    # out_ref: [8, 128]          lane-dense partial sum for this (batch, tile) grid point

    x = p_ref[...].astype(jnp.float32)            # (L, tile_m, 128)
    t = t_ref[...] != 0                           # (tile_m, 128) bool

    if need_softmax:
        mx = jnp.max(x, axis=0)                   # elementwise max over L slabs (VPU)
        e = jnp.exp(x - mx[None, :, :])           # L exps per pixel (EUP)
        denom = jnp.sum(e, axis=0)                # L-1 elementwise adds (VPU)
        e_sel = jnp.where(t, e[1], e[0])          # select BEFORE the divide / log
        p_sel = e_sel / denom
    else:
        p_sel = jnp.where(t, x[1], x[0])

    one_m = 1.0 - p_sel
    g = float(gamma)
    if g == 2.0:                                  # default: explicit square, no pow
        pw = one_m * one_m
    elif g == float(int(g)) and g >= 0.0:
        pw = lax.integer_pow(one_m, int(g))
    else:                                         # general (non-integral) gamma
        pw = one_m ** g

    w = jnp.where(t, jnp.float32(-alpha), jnp.float32(alpha - 1.0))
    term = pw * jnp.log(p_sel + EPSILON) * w
    # torch.nansum semantics: NaNs contribute 0
    term = jnp.where(jnp.isnan(term), jnp.float32(0.0), term)

    if need_mask:
        # zero out padded tail pixels (only generated when padding exists)
        row_ids = lax.broadcasted_iota(jnp.int32, (tile_m, 128), 0)
        lane_ids = lax.broadcasted_iota(jnp.int32, (tile_m, 128), 1)
        pos = (pl.program_id(1) * tile_m + row_ids) * 128 + lane_ids
        term = jnp.where(pos < hw, term, jnp.float32(0.0))

    # Sublane-group partial sum (tile_m,128) -> (8,128): tile-aligned static slices,
    # pure VPU adds, lane-dense unmasked store.
    partial = term[0:8, :]
    for i in range(1, tile_m // 8):
        partial = partial + term[i * 8:(i + 1) * 8, :]
    out_ref[...] = partial


def focal_loss(prediction_image, target_image, alpha=0.75, gamma=2.0,
               need_softmax=True, tile_m_max=256):
    """prediction_image: [B, L, H, W] float; target_image: [B, H, W] int in {0..L-1}."""
    B, L, H, W = prediction_image.shape
    HW = H * W
    N = B * HW

    # --- tiling: rows of 128 lanes, tile_m rows per grid step (multiple of 8) ---
    rows = -(-HW // 128)
    rows8 = -(-rows // 8) * 8
    # keep the (double-buffered) prediction block comfortably small even on v7x VMEM
    vmem_cap_rows = max(8, (8 * 1024 * 1024) // (L * 128 * 4 * 2) // 8 * 8)
    tile_m = max(8, (min(int(tile_m_max), rows8, vmem_cap_rows) // 8) * 8)
    rows_pad = -(-rows8 // tile_m) * tile_m
    HW_pad = rows_pad * 128
    num_tiles = rows_pad // tile_m
    need_mask = HW_pad != HW

    # --- glue: reshapes are free; pad only when HW is not tile-aligned ---
    p = prediction_image.reshape(B, L, HW)
    t = target_image.reshape(B, HW)
    if jnp.issubdtype(t.dtype, jnp.bool_):
        t = t.astype(jnp.int32)
    if need_mask:
        pad = HW_pad - HW
        p = jnp.pad(p, ((0, 0), (0, 0), (0, pad)))
        t = jnp.pad(t, ((0, 0), (0, pad)))
    p = p.reshape(B, L, rows_pad, 128)
    t = t.reshape(B, rows_pad, 128)

    kernel = functools.partial(
        _focal_kernel, alpha=float(alpha), gamma=float(gamma),
        tile_m=tile_m, hw=HW, need_mask=need_mask,
        need_softmax=bool(need_softmax))

    partials = pl.pallas_call(
        kernel,
        out_shape=jax.ShapeDtypeStruct((B, num_tiles, 8, 128), jnp.float32),
        grid=(B, num_tiles),
        in_specs=[
            pl.BlockSpec((None, L, tile_m, 128), lambda b, j: (b, 0, j, 0)),
            pl.BlockSpec((None, tile_m, 128), lambda b, j: (b, j, 0)),
        ],
        out_specs=pl.BlockSpec((None, None, 8, 128), lambda b, j: (b, j, 0, 0)),
        compiler_params=pltpu.CompilerParams(
            dimension_semantics=("parallel", "parallel")),
    )(p, t)

    # denominator = (#neg pixels + #pos pixels) = B*H*W
    return jnp.sum(partials) / jnp.float32(N)


def _focal_loss_ref(prediction_image, target_image, alpha=0.75, gamma=2.0):
    p = jax.nn.softmax(prediction_image.astype(jnp.float32), axis=1)
    t = target_image != 0
    p0 = p[:, 0, :, :]
    p1 = p[:, 1, :, :]
    neg = jnp.where(~t, ((1.0 - p0) ** gamma) * jnp.log(p0 + EPSILON), 0.0)
    pos = jnp.where(t, ((1.0 - p1) ** gamma) * jnp.log(p1 + EPSILON), 0.0)
    neg_temp = jnp.nansum(neg) * (alpha - 1.0)
    pos_temp = jnp.nansum(pos) * (-alpha)
    n = target_image.size
    return (neg_temp + pos_temp) / n


if __name__ == "__main__":
    key = jax.random.PRNGKey(0)
    k1, k2 = jax.random.split(key)

    B, L, H, W = 2, 4, 16, 16
    pred = jax.random.normal(k1, (B, L, H, W), dtype=jnp.float32)
    target = jax.random.randint(k2, (B, H, W), 0, L, dtype=jnp.int32)

    out = focal_loss(pred, target, alpha=0.75, gamma=2.0)
    out = jax.block_until_ready(out)

    ref = _focal_loss_ref(pred, target, alpha=0.75, gamma=2.0)
    assert jnp.allclose(out, ref, rtol=1e-4, atol=1e-5), (out, ref)

    print("KERNEL_OK")
</pallas_src>

<mosaic_0001>
module attributes {stable_mosaic.version = 11 : i64} {
  func.func @_focal_kernel(%arg0: i32, %arg1: i32, %arg2: memref<1x4x8x128xf32, #tpu.memory_space<vmem>>, %arg3: memref<1x8x128xi32, #tpu.memory_space<vmem>>, %arg4: memref<1x1x8x128xf32, #tpu.memory_space<vmem>>) attributes {dimension_semantics = [#tpu.dimension_semantics<parallel>, #tpu.dimension_semantics<parallel>], iteration_bounds = array<i64: 2, 1>, scalar_prefetch = 0 : i64, scratch_operands = 0 : i64, tpu.core_type = #tpu.core_type<tc>, window_params = [{transform_indices = @transform_0, window_bounds = array<i64: 1, 4, 8, 128>}, {transform_indices = @transform_1, window_bounds = array<i64: 1, 8, 128>}, {transform_indices = @transform_2, window_bounds = array<i64: 1, 1, 8, 128>}]} {
    %c0 = arith.constant 0 : index
    %c0_0 = arith.constant 0 : index
    %c0_1 = arith.constant 0 : index
    %c0_2 = arith.constant 0 : index
    %0 = vector.load %arg2[%c0, %c0_0, %c0_1, %c0_2] : memref<1x4x8x128xf32, #tpu.memory_space<vmem>>, vector<1x4x8x128xf32>
    %1 = vector.shape_cast %0 : vector<1x4x8x128xf32> to vector<4x8x128xf32>
    %c0_3 = arith.constant 0 : index
    %c0_4 = arith.constant 0 : index
    %c0_5 = arith.constant 0 : index
    %2 = vector.load %arg3[%c0_3, %c0_4, %c0_5] : memref<1x8x128xi32, #tpu.memory_space<vmem>>, vector<1x8x128xi32>
    %3 = vector.shape_cast %2 : vector<1x8x128xi32> to vector<8x128xi32>
    %c0_i32 = arith.constant 0 : i32
    %4 = vector.broadcast %c0_i32 : i32 to vector<8x128xi32>
    %5 = arith.cmpi ne, %3, %4 : vector<8x128xi32>
    %cst = arith.constant dense<0xFF800000> : vector<8x128xf32>
    %6 = vector.multi_reduction <maximumf>, %1, %cst [0] : vector<4x8x128xf32> to vector<8x128xf32>
    %7 = vector.shape_cast %6 : vector<8x128xf32> to vector<1x8x128xf32>
    %8 = vector.broadcast %7 : vector<1x8x128xf32> to vector<4x8x128xf32>
    %9 = arith.subf %1, %8 : vector<4x8x128xf32>
    %10 = math.exp %9 : vector<4x8x128xf32>
    %cst_6 = arith.constant dense<0.000000e+00> : vector<8x128xf32>
    %11 = vector.multi_reduction <add>, %10, %cst_6 [0] : vector<4x8x128xf32> to vector<8x128xf32>
    %12 = vector.extract_strided_slice %10 {offsets = [1, 0, 0], sizes = [1, 8, 128], strides = [1, 1, 1]} : vector<4x8x128xf32> to vector<1x8x128xf32>
    %13 = vector.shape_cast %12 : vector<1x8x128xf32> to vector<8x128xf32>
    %14 = vector.extract_strided_slice %10 {offsets = [0, 0, 0], sizes = [1, 8, 128], strides = [1, 1, 1]} : vector<4x8x128xf32> to vector<1x8x128xf32>
    %15 = vector.shape_cast %14 : vector<1x8x128xf32> to vector<8x128xf32>
    %16 = arith.select %5, %13, %15 : vector<8x128xi1>, vector<8x128xf32>
    %17 = arith.divf %16, %11 : vector<8x128xf32>
    %cst_7 = arith.constant 1.000000e+00 : f32
    %18 = vector.broadcast %cst_7 : f32 to vector<8x128xf32>
    %19 = arith.subf %18, %17 : vector<8x128xf32>
    %20 = arith.mulf %19, %19 : vector<8x128xf32>
    %cst_8 = arith.constant -7.500000e-01 : f32
    %cst_9 = arith.constant -2.500000e-01 : f32
    %21 = vector.broadcast %cst_8 : f32 to vector<8x128xf32>
    %22 = vector.broadcast %cst_9 : f32 to vector<8x128xf32>
    %23 = arith.select %5, %21, %22 : vector<8x128xi1>, vector<8x128xf32>
    %cst_10 = arith.constant 9.99999997E-7 : f32
    %24 = vector.broadcast %cst_10 : f32 to vector<8x128xf32>
    %25 = arith.addf %17, %24 : vector<8x128xf32>
    %26 = math.log %25 : vector<8x128xf32>
    %27 = arith.mulf %20, %26 : vector<8x128xf32>
    %28 = arith.mulf %27, %23 : vector<8x128xf32>
    %29 = arith.cmpf one, %28, %28 : vector<8x128xf32>
    %cst_11 = arith.constant 0.000000e+00 : f32
    %30 = vector.broadcast %cst_11 : f32 to vector<8x128xf32>
    %31 = arith.select %29, %30, %28 : vector<8x128xi1>, vector<8x128xf32>
    %32 = tpu.iota {dimensions = array<i32: 0>} : vector<8x128xi32>
    %33 = tpu.iota {dimensions = array<i32: 1>} : vector<8x128xi32>
    %c8_i32 = arith.constant 8 : i32
    %34 = arith.muli %arg1, %c8_i32 : i32
    %35 = vector.broadcast %34 : i32 to vector<8x128xi32>
    %36 = arith.addi %35, %32 : vector<8x128xi32>
    %c128_i32 = arith.constant 128 : i32
    %37 = vector.broadcast %c128_i32 : i32 to vector<8x128xi32>
    %38 = arith.muli %36, %37 : vector<8x128xi32>
    %39 = arith.addi %38, %33 : vector<8x128xi32>
    %c256_i32 = arith.constant 256 : i32
    %40 = vector.broadcast %c256_i32 : i32 to vector<8x128xi32>
    %41 = arith.cmpi slt, %39, %40 : vector<8x128xi32>
    %cst_12 = arith.constant 0.000000e+00 : f32
    %42 = vector.broadcast %cst_12 : f32 to vector<8x128xf32>
    %43 = arith.select %41, %31, %42 : vector<8x128xi1>, vector<8x128xf32>
    %c0_13 = arith.constant 0 : index
    %c0_14 = arith.constant 0 : index
    %c0_15 = arith.constant 0 : index
    %c0_16 = arith.constant 0 : index
    %44 = vector.load %arg4[%c0_13, %c0_14, %c0_15, %c0_16] : memref<1x1x8x128xf32, #tpu.memory_space<vmem>>, vector<1x1x8x128xf32>
    %45 = vector.shape_cast %44 : vector<1x1x8x128xf32> to vector<8x128xf32>
    %46 = vector.shape_cast %43 : vector<8x128xf32> to vector<1x1x8x128xf32>
    tpu.vector_store %arg4[%c0_13, %c0_14, %c0_15, %c0_16], %46 {strides = array<i32>} : memref<1x1x8x128xf32, #tpu.memory_space<vmem>>, vector<1x1x8x128xf32>,
    return
  }
  func.func @transform_0(%arg0: i32, %arg1: i32) -> (i32, i32, i32, i32) {
    %c0_i32 = arith.constant 0 : i32
    %c0_i32_0 = arith.constant 0 : i32
    %c0_i32_1 = arith.constant 0 : i32
    return %arg0, %c0_i32, %arg1, %c0_i32_0 : i32, i32, i32, i32
  }
  func.func @transform_1(%arg0: i32, %arg1: i32) -> (i32, i32, i32) {
    %c0_i32 = arith.constant 0 : i32
    %c0_i32_0 = arith.constant 0 : i32
    return %arg0, %arg1, %c0_i32 : i32, i32, i32
  }
  func.func @transform_2(%arg0: i32, %arg1: i32) -> (i32, i32, i32, i32) {
    %c0_i32 = arith.constant 0 : i32
    %c0_i32_0 = arith.constant 0 : i32
    %c0_i32_1 = arith.constant 0 : i32
    return %arg0, %arg1, %c0_i32, %c0_i32_0 : i32, i32, i32, i32
  }
}

</mosaic_0001>

<bundles_post_ra>
// kernel: tpu_custom_call.1
= control target key start
LH: loop header
LB: loop body
LE: loop exit
PB: predicated region body
PF: predicated region fallthrough
CT: control target
= control target key end

     0   :  { %7 = vsyncpa [#allocation3], 0  ;;  %s876_s0 = inlined_call_operand.hbm [shape: f32[2,4,8,128], index: 0, kind: input, shape index: {}]   ;;  %s877_s1 = inlined_call_operand.hbm [shape: s32[2,8,128], index: 1, kind: input, shape index: {}]   ;;  %s878_s2 = inlined_call_operand.hbm [shape: f32[2,1,8,128], index: 2, kind: output, shape index: {}]  }
   0x1   :  { %9 = vsyncpa [#allocation3 + $0x1], 0 }
   0x2   :  { %10 = vsyncpa [#allocation6], 0 }
   0x3   :  { %12 = vsyncpa [#allocation6 + $0x1], 0 }
   0x4   :  { %13 = vsyncpa [#allocation4], 0 }
   0x5   :  { %15 = vsyncpa [#allocation4 + $0x1], 0  ;;  %s657_s9 = smov 0   ;;  %s659_s10 = smov 0  }
   0x6   :  { %s661_s11 = smov 0   ;;  %s663_s12 = smov 0  }
   0x7   :  { %s665_s13 = smov 0   ;;  %s667_s14 = smov 0  }
   0x8 LB: > { %s388_s15 = sadd.s32 4294967295, %s634_s14   ;;  %s389_s16 = sadd.s32 4294967294, %s634_s14   ;;  %s634_s14 = sphi %s667_s14, %s21_s14   ;;  %s630_s13 = sphi %s665_s13, %s897_s13   ;;  %s626_s12 = sphi %s663_s12, %s896_s12   ;;  %s622_s11 = sphi %s661_s11, %s895_s11   ;;  %s618_s10 = sphi %s659_s10, %s894_s10   ;;  %s614_s9 = sphi %s657_s9, %s893_s9  }
   0x9   : > { %s33_s17 = sadd.s32 1, %s630_s13  ;;  %s42_s18 = sadd.s32 1, %s622_s11 }
   0xa   : > { %p35_p0 = scmp.ge.s32.totalorder %s33_s17, 2  ;;  %p49_p1 = scmp.ne.s32.totalorder %s622_s11, %s618_s10 }
   0xb   : > { %p50_p2 = scmp.eq.s32.totalorder %s634_s14, 0  ;;  %p55_p3 = scmp.ne.s32.totalorder %s618_s10, %s614_s9 }
   0xc   : > { %s899_s17 = smov (%p35_p0, %s33_s17), 0  ;;  %p56_p5 = scmp.eq.s32.totalorder %s388_s15, 0 }
   0xd   : > { %p698_p4 = por %p50_p2, %p49_p1  ;;  %s37_s20 = ssub.s32 %s630_s13, %s899_s17 }
   0xe   : > { %p109_p6 = scmp.eq.s32.totalorder %s388_s15, 1  ;;  %p40_p7 = scmp.eq.s32.totalorder %s37_s20, 0 }
   0xf   : > { %p704_p8 = por %p56_p5, %p55_p3  ;;  %p115_p10 = scmp.eq.s32.totalorder %s389_s16, 1 }
  0x10   : > { %p708_p9 = por %p109_p6, %p49_p1  ;;  %p423_p13 = scmp.lt.s32.totalorder %s634_s14, 2 }
  0x11   : > { %s882_s21 = scalar_select %p704_p8, 1, 0 }
  0x12   : > { %s883_s22 = scalar_select %p708_p9, 1, 0 }
  0x13   : > { %s713_s23 = scalar_select %p40_p7, %s622_s11, %s42_s18  }
  0x14   : > { %p715_p11 = por %p115_p10, %p55_p3  ;;  %s722_s25 = sand.u32 1, %s622_s11  }
  0x15   : > { %s392_s26 = sshll.u32 %s722_s25, 5  ;;  %s405_s27 = sshll.u32 %s630_s13, 9 }
  0x16   : > { %s884_s24 = scalar_select %p715_p11, 1, 0 }
  0x17   : > { %s729_s30 = scalar_lea.hbm %s876_s0, %s405_s27  ;;  %s139_s3 = scalar_lea.vmem [#allocation2], %s392_s26 }
  0x18   : > { %s147_s4 = sshll.u32 %s139_s3, 4  ;;  %p735_p0 = pnand %p423_p13, %p698_p4  ;;  %s731_s4 = int_to_ptr.vmem [resolvable:$true] %s147_s4 }
  0x19   : > { %s136_s6 = scalar_lea.sflag [#allocation3], %s722_s25  ;;  %s488_s7 = scalar_lea.hbm %s729_s30, 512 }
  0x1a   : > { %p489_p2 = scmp.ne.s32.totalorder %s729_s30, %s488_s7  ;;  %p490_p3 = pneg %p735_p0 }
  0x1b   : > { %s493_s16 = scalar_lea.hbm %s876_s0, 1024  ;;  %p494_p4 = scmp.lt.u32.totalorder %s729_s30, %s876_s0 }
  0x1c   : > { %p491_p5 = pnand %p490_p3, %p489_p2  ;;  %p495_p7 = scmp.lt.u32.totalorder %s493_s16, %s488_s7 }
  0x1d   : > { %p497_p13 = scmp.lt.u32.totalorder %s488_s7, %s729_s30 }
  0x1e   : > { %p492_p6 = pneg %p491_p5  ;;  %p496_p10 = por %p495_p7, %p494_p4 }
  0x20   : > { %p498_p12 = por %p497_p13, %p496_p10 }
  0x22   : > { %p499_p1 = pnand %p498_p12, %p492_p6 }
  0x24   : > { %502 = shalt.err (!%p499_p1)
}
  0x25   : > { %s503_s20 = scalar_lea.vmem %s731_s4, 512  ;;  %s636_s26 = smov [#allocation2]  }
  0x26   : > { %p504_p2 = scmp.ne.s32.totalorder %s731_s4, %s503_s20  ;;  %s508_s27 = sshll.u32 %s636_s26, 4  ;;  %s509_s27 = int_to_ptr.vmem [resolvable:$false] %s508_s27 }
  0x27   : > { %s510_s28 = scalar_lea.vmem %s509_s27, 1024  ;;  %p511_p9 = scmp.lt.s32.totalorder %s731_s4, %s509_s27 }
  0x28   : > { %p506_p5 = pnand %p504_p2, %p490_p3  ;;  %p512_p4 = scmp.lt.s32.totalorder %s510_s28, %s503_s20 }
  0x2a   : > { %p507_p11 = pneg %p506_p5  ;;  %p513_p7 = por %p512_p4, %p511_p9 }
  0x2c   : > { %p514_p10 = pnand %p513_p7, %p507_p11 }
  0x2e   : > { %517 = shalt.err (!%p514_p10)
}
  0x2f   : > { %s637_s29 = smov 128   ;;  %s638_s3 = smov 8  }
  0x30   : > { %415 = dma.hbm_to_vmem [thread:$0]  (!%p735_p0), %s729_s30, 512, %s731_s4, %s136_s6, %s637_s29, %s637_s29, %s638_s3  }
  0x31   : > { %p174_p12 = scmp.lt.s32.totalorder %s634_s14, 3  ;;  %s395_s7 = sshll.u32 %s722_s25, 3 }
  0x32   : > { %s396_s8 = sshll.u32 %s630_s13, 7  ;;  %p886_p9 = scmp.ge.s32.totalorder %s634_s14, 1 }
  0x33   : > { %s780_s19 = scalar_lea.hbm %s877_s1, %s396_s8  ;;  %s161_s20 = scalar_lea.vmem [#allocation5], %s395_s7 }
  0x34   : > { %p773_p11 = pnand %p886_p9, %p174_p12  ;;  %s169_s26 = sshll.u32 %s161_s20, 4  ;;  %s170_s26 = int_to_ptr.vmem [resolvable:$true] %s169_s26 }
  0x35   : > { %s158_s30 = scalar_lea.sflag [#allocation6], %s722_s25  ;;  %s518_s4 = scalar_lea.hbm %s780_s19, 128 }
  0x36   : > { %s887_s15 = scalar_select %p773_p11, 1, 0 }
  0x37   : > { %p519_p1 = scmp.ne.s32.totalorder %s780_s19, %s518_s4  ;;  %s523_s28 = scalar_lea.hbm %s877_s1, 256 }
  0x38   : > { %p524_p2 = scmp.lt.u32.totalorder %s780_s19, %s877_s1  ;;  %p525_p5 = scmp.lt.u32.totalorder %s523_s28, %s518_s4 }
  0x39   : > { %p521_p6 = pnand %p519_p1, %p490_p3  ;;  %p527_p7 = scmp.lt.u32.totalorder %s518_s4, %s780_s19 }
  0x3a   : > { %p526_p4 = por %p525_p5, %p524_p2 }
  0x3b   : > { %p522_p13 = pneg %p521_p6 }
  0x3c   : > { %p528_p10 = por %p527_p7, %p526_p4 }
  0x3e   : > { %p529_p12 = pnand %p528_p10, %p522_p13 }
  0x40   : > { %532 = shalt.err (!%p529_p12)
}
  0x41   : > { %s533_s25 = scalar_lea.vmem %s170_s26, 128  ;;  %s639_s7 = smov [#allocation5]  }
  0x42   : > { %p534_p9 = scmp.ne.s32.totalorder %s170_s26, %s533_s25  ;;  %s538_s8 = sshll.u32 %s639_s7, 4  ;;  %s539_s8 = int_to_ptr.vmem [resolvable:$false] %s538_s8 }
  0x43   : > { %s540_s16 = scalar_lea.vmem %s539_s8, 256  ;;  %p541_p8 = scmp.lt.s32.totalorder %s170_s26, %s539_s8 }
  0x44   : > { %p536_p1 = pnand %p534_p9, %p490_p3  ;;  %p542_p11 = scmp.lt.s32.totalorder %s540_s16, %s533_s25 }
  0x46   : > { %p537_p6 = pneg %p536_p1  ;;  %p543_p2 = por %p542_p11, %p541_p8 }
  0x48   : > { %p544_p5 = pnand %p543_p2, %p537_p6 }
  0x4a   : > { %547 = shalt.err (!%p544_p5)
}
  0x4b   : > { %418 = dma.hbm_to_vmem [thread:$0]  (!%p735_p0), %s780_s19, 128, %s170_s26, %s158_s30  }
  0x4c   : > { %p888_p13 = scmp.ne.s32.totalorder %s887_s15, 0 }
  0x4d   : > { %s805_s18 = sand.u32 (!%p888_p13), 1, %s618_s10   ;;  %p889_p3 = scmp.ne.s32.totalorder (!%p888_p13), %s882_s21, 0 }
  0x4e   : > { %178 = sbr.rel (%p888_p13) target bundleno = 166 (0xa6), region = 28  ;;  %s398_s20 = sshll.u32 (!%p888_p13), %s805_s18, 5 }
  0x4f   : > { %s181_s4 = scalar_lea.sflag (!%p888_p13), [#allocation3], %s805_s18  ;;  %s184_s6 = scalar_lea.vmem (!%p888_p13), [#allocation2], %s398_s20 }
  0x55   : > { %601 = dma.done.wait (%p889_p3), %s181_s4, 512  }
  0x56   : > { %603 = vsyncadd (%p889_p3), %s181_s4, 4294966784  ;;  %s399_s5 = sshll.u32 %s805_s18, 3  ;;  %s190_s15 = scalar_lea.sflag [#allocation6], %s805_s18 }
  0x57   : > { %s193_s19 = scalar_lea.vmem [#allocation5], %s399_s5 }
  0x58   : > { %605 = dma.done.wait (%p889_p3), %s190_s15, 128  }
  0x59   : > { %607 = vsyncadd (%p889_p3), %s190_s15, 4294967168  ;;  %v219_v0 = vld [vmem:[%s184_s6] sm:$0xff]  ;;  %v220_v1 = vld [vmem:[%s184_s6 + $0x8] sm:$0xff]  ;;  %v256_v27 = vlaneseq  ;;  %v640_v35 = vmov -0.25   ;;  %s218_s21 = scalar_lea.vmem [#allocation7], %s399_s5  ;;  %s402_s30 = sshll.u32 %s626_s12, 7 }
  0x5a   : > { %v221_v2 = vld [vmem:[%s184_s6 + $0x10] sm:$0xff]  ;;  %v222_v3 = vld [vmem:[%s184_s6 + $0x18] sm:$0xff]  ;;  %v225_v4 = vmax.f32 %v219_v0, %v220_v1  ;;  %v223_v22 = vld [vmem:[%s193_s19] sm:$0xff]  ;;  %s283_s26 = sshll.u32 %s218_s21, 4  ;;  %s829_s29 = scalar_lea.hbm %s878_s2, %s402_s30  ;;  %s824_s26 = int_to_ptr.vmem [resolvable:$true] %s283_s26 }
  0x5b   : > { %v226_v5 = vmax.f32 %v221_v2, %v222_v3  ;;  %vm224_vm0 = vcmp.ne.s32.totalorder %v223_v22, 0  ;;  %v257_v28 = vshrl.u32 %v256_v27, 7  ;;  %v259_v30 = vand.u32 127, %v256_v27  ;;  %s269_s3 = scalar_lea.sflag [#allocation4], %s805_s18  ;;  %s548_s25 = scalar_lea.vmem %s824_s26, 128 }
  0x5c   : > { %v248_v36 = vsel %vm224_vm0, -0.75, %v640_v35  ;;  %p549_p8 = scmp.ne.s32.totalorder %s824_s26, %s548_s25  ;;  %p890_p0 = scmp.ne.s32.totalorder %s883_s22, 0 }
  0x5d   : > { %v227_v6 = vmax.f32 %v225_v4, %v226_v5  ;;  %v263_v31 = vmul.u32 128, %v257_v28  ;;  %s641_s12 = smov [#allocation7]  }
  0x5e   : > { %p550_p11 = pnand %p549_p8, %p890_p0  ;;  %s552_s7 = sshll.u32 %s641_s12, 4  ;;  %s553_s7 = int_to_ptr.vmem [resolvable:$false] %s552_s7 }
  0x5f   : > { %v228_v7 = vsub.f32 %v219_v0, %v227_v6  ;;  %v229_v8 = vsub.f32 %v220_v1, %v227_v6  ;;  %v230_v9 = vsub.f32 %v221_v2, %v227_v6  ;;  %v231_v10 = vsub.f32 %v222_v3, %v227_v6  ;;  %s554_s8 = scalar_lea.vmem %s553_s7, 256  ;;  %p555_p7 = scmp.lt.s32.totalorder %s824_s26, %s553_s7 }
  0x60   : > { %v264_v37 = vadd.s32 %v263_v31, %v259_v30  ;;  %p551_p4 = pneg %p550_p11  ;;  %p556_p10 = scmp.lt.s32.totalorder %s554_s8, %s548_s25 }
  0x61   : > { %v232_v11 = vmul.f32 1.442695, %v228_v7  ;;  %v234_v12 = vmul.f32 1.442695, %v229_v8  ;;  %v236_v13 = vmul.f32 1.442695, %v230_v9 }
  0x62   : > { %v238_v14 = vmul.f32 1.442695, %v231_v10  ;;  %vm265_vm1 = vcmp.lt.s32.totalorder %v264_v37, 256  ;;  %p557_p12 = por %p556_p10, %p555_p7 }
  0x63   : > { %476 = vpow2.f32 %v232_v11 }
  0x64   : > { %478 = vpow2.f32 %v234_v12  ;;  %p558_p9 = pnand %p557_p12, %p551_p4 }
  0x65   : > { %480 = vpow2.f32 %v236_v13 }
  0x66   : > { %482 = vpow2.f32 %v238_v14 }
  0x6d   : > { %v477_v15 = vpop.eup %476 }
  0x6e   : > { %v479_v16 = vpop.eup %478 }
  0x6f   : > { %v481_v17 = vpop.eup %480  ;;  %v240_v18 = vadd.f32 %v479_v16, %v477_v15  ;;  %v243_v23 = vsel %vm224_vm0, %v479_v16, %v477_v15 }
  0x70   : > { %v483_v19 = vpop.eup %482 }
  0x71   : > { %v241_v20 = vadd.f32 %v481_v17, %v240_v18 }
  0x73   : > { %v242_v21 = vadd.f32 %v483_v19, %v241_v20 }
  0x75   : > { %484 = vrcp.f32 %v242_v21 }
  0x7f   : > { %v485_v24 = vpop.eup %484 }
  0x80   : > { %v245_v25 = vmul.f32 %v485_v24, %v243_v23 }
  0x82   : > { %v249_v26 = vadd.f32 1e-06, %v245_v25  ;;  %v246_v29 = vsub.f32 1.0, %v245_v25 }
  0x84   : > { %486 = vlog2.f32 %v249_v26  ;;  %v247_v32 = vmul.f32 %v246_v29, %v246_v29 }
  0x8e   : > { %v487_v33 = vpop.eup %486 }
  0x8f   : > { %v251_v34 = vmul.f32 0.6931472, %v487_v33 }
  0x91   : > { %v252_v38 = vmul.f32 %v251_v34, %v247_v32 }
  0x93   : > { %v253_v39 = vmul.f32 %v252_v38, %v248_v36 }
  0x95   : > { %vm254_vm2 = vcmp.ne.f32.partialorder %v253_v39, %v253_v39 }
  0x96   : > { %v255_v40 = vsel %vm254_vm2, 0.0, %v253_v39 }
  0x97   : > { %v266_v41 = vsel %vm265_vm1, %v255_v40, 0.0 }
  0x98   : > { %267 = vst [vmem:[%s218_s21] sm:$0xff] %v266_v41 }
  0x99   : > { %561 = shalt.err (!%p558_p9)
}
  0x9a   : > { %s562_s16 = scalar_lea.hbm %s829_s29, 128  ;;  %s566_s4 = scalar_lea.hbm %s878_s2, 256 }
  0x9b   : > { %p563_p1 = scmp.ne.s32.totalorder %s829_s29, %s562_s16  ;;  %p567_p5 = scmp.lt.u32.totalorder %s829_s29, %s878_s2 }
  0x9c   : > { %p568_p13 = scmp.lt.u32.totalorder %s566_s4, %s562_s16  ;;  %p570_p8 = scmp.lt.u32.totalorder %s562_s16, %s829_s29 }
  0x9d   : > { %p564_p6 = pnand %p563_p1, %p890_p0 }
  0x9e   : > { %p569_p3 = por %p568_p13, %p567_p5 }
  0x9f   : > { %p565_p2 = pneg %p564_p6 }
  0xa0   : > { %p571_p11 = por %p570_p8, %p569_p3 }
  0xa2   : > { %p572_p4 = pnand %p571_p11, %p565_p2 }
  0xa4   : > { %575 = shalt.err (!%p572_p4)
}
  0xa5   : > { %410 = dma.vmem_to_hbm [thread:$0]  (%p890_p0), %s824_s26, 128, %s829_s29, %s269_s3  }
  0xa6 PF: > { %s295_s15 = sand.u32 1, %s614_s9   ;;  %p891_p7 = scmp.ne.s32.totalorder %s884_s24, 0 }
  0xa7   : > { %p892_p10 = scmp.ge.s32.totalorder %s634_s14, 2  ;;  %s296_s19 = scalar_lea.sflag [#allocation4], %s295_s15 }
  0xa9   : > { %p420_p12 = pnand %p892_p10, %p891_p7 }
  0xab   : > { %609 = dma.done.wait (!%p420_p12), %s296_s19, 128  }
  0xac   : > { %611 = vsyncadd (!%p420_p12), %s296_s19, 4294967168  ;;  %s21_s14 = sadd.s32 1, %s634_s14   ;;  %s893_s9 = smov %s618_s10 }
  0xad   : > { %p18_p9 = scmp.ge.s32.totalorder %s21_s14, 4   ;;  %s894_s10 = smov %s622_s11 }
  0xae   : > { %s895_s11 = smov %s713_s23  ;;  %s896_s12 = smov %s630_s13 }
  0xaf   : > { %s897_s13 = smov %s899_s17  ;;  %20 = sbr.rel (!%p18_p9) target bundleno = 8 (0x8), region = 86 }
  0xb6   :  { %301 = vsyncpa [#allocation3], 1 }
  0xb7   :  { %303 = vsyncpa [#allocation3 + $0x1], 1 }
  0xb8   :  { %304 = vsyncpa [#allocation6], 1 }
  0xb9   :  { %306 = vsyncpa [#allocation6 + $0x1], 1 }
  0xba   :  { %307 = vsyncpa [#allocation4], 1 }
  0xbb   :  { %309 = vsyncpa [#allocation4 + $0x1], 1 }

</bundles_post_ra>
